<compile_context>
chip_gen: v7x
topology: tpu7x:2x2x1
jax: 0.10.0
libtpu: 0.0.40
codegen_flags: <defaults>
</compile_context>

<pallas_src>
import jax
import jax.numpy as jnp
from jax.experimental import pallas as pl
from jax.experimental.pallas import tpu as pltpu

NUM_CLASSES = 3
LANE = 128


def rnn_classify_kernel(tok_ref, proj_ref, whh_ref, wcls_ref, bcls_ref, out_ref):
    """tanh-RNN recurrence over pre-projected embeddings + padded classifier.

    tok_ref : (B, S)        int32  token ids (SMEM)
    proj_ref: (vocab, 1, D) f32    pre-projected embedding table:
                                   emb @ W_ih + (b_ih + b_hh)   (VMEM)
    whh_ref : (D, D)        f32    hidden->hidden weight (pre-transposed)
    wcls_ref: (D, 128)      f32    classifier weight, zero-padded past col 3
    bcls_ref: (1, 128)      f32    classifier bias, zero-padded past col 3
    out_ref : (B, 128)      f32    padded logits (cols >= 3 are zero)
    """
    B, S = tok_ref.shape
    whh = whh_ref[...]

    def x_t(t):
        # Gather pre-projected rows for timestep t (RNN bias already folded in).
        rows = [proj_ref[tok_ref[b, t]] for b in range(B)]      # each (1, D)
        return rows[0] if B == 1 else jnp.concatenate(rows, axis=0)  # (B, D)

    # Step 0: h_{-1} == 0, so the recurrent matmul vanishes.
    h = jnp.tanh(x_t(0))
    # Remaining steps, fully unrolled (S is a small static constant).
    for t in range(1, S):
        h = jnp.tanh(x_t(t) +
                     jnp.dot(h, whh, preferred_element_type=jnp.float32))

    logits = (jnp.dot(h, wcls_ref[...], preferred_element_type=jnp.float32)
              + bcls_ref[...])
    out_ref[...] = logits.astype(out_ref.dtype)


@jax.jit
def torchmodel_forward(x_tokens, kparams):
    """x_tokens: (B, S) int32 token ids. Returns logits (B, 3)."""
    tokens = x_tokens.astype(jnp.int32)
    B = tokens.shape[0]
    vmem = pl.BlockSpec(memory_space=pltpu.MemorySpace.VMEM)
    smem = pl.BlockSpec(memory_space=pltpu.MemorySpace.SMEM)

    padded = pl.pallas_call(
        rnn_classify_kernel,
        out_shape=jax.ShapeDtypeStruct((B, LANE), jnp.float32),
        in_specs=[smem, vmem, vmem, vmem, vmem],
        out_specs=vmem,
    )(
        tokens,
        kparams["proj_table"],   # (vocab, 1, D)
        kparams["w_hh"],         # (D, D)
        kparams["w_cls_pad"],    # (D, 128)
        kparams["b_cls_pad"],    # (1, 128)
    )
    return padded[:, :NUM_CLASSES]


def init_params(key, vocab_size, vector_dim, num_classes=NUM_CLASSES):
    """PyTorch-equivalent parameters (nn.RNN / nn.Linear layout, pre-transposed
    so the kernel right-multiplies: x @ W^T <-> x @ w)."""
    ks = jax.random.split(key, 7)
    scale = 1.0 / jnp.sqrt(vector_dim)
    emb = jax.random.normal(ks[0], (vocab_size, vector_dim), jnp.float32)
    w_ih = jax.random.uniform(ks[1], (vector_dim, vector_dim), jnp.float32,
                              -scale, scale)
    w_hh = jax.random.uniform(ks[2], (vector_dim, vector_dim), jnp.float32,
                              -scale, scale)
    b_ih = jax.random.uniform(ks[3], (vector_dim,), jnp.float32, -scale, scale)
    b_hh = jax.random.uniform(ks[4], (vector_dim,), jnp.float32, -scale, scale)
    w_cls = jax.random.uniform(ks[5], (vector_dim, num_classes), jnp.float32,
                               -scale, scale)
    b_cls = jax.random.uniform(ks[6], (num_classes,), jnp.float32, -scale, scale)
    return {
        "embedding": emb,
        "w_ih": w_ih,
        "w_hh": w_hh,
        "b_rnn": (b_ih + b_hh).reshape(1, vector_dim),
        "w_cls": w_cls,
        "b_cls": b_cls.reshape(1, num_classes),
    }


def prep_kernel_params(params):
    """One-time (outside the forward pass) prep:
    - fold the input projection + RNN bias into the embedding table,
    - zero-pad the classifier to 128 lanes for an unmasked output store."""
    vocab, d = params["embedding"].shape
    proj = (params["embedding"].astype(jnp.float32) @ params["w_ih"]
            + params["b_rnn"])                               # (vocab, D)
    w_cls_pad = jnp.zeros((d, LANE), jnp.float32).at[:, :NUM_CLASSES].set(
        params["w_cls"])
    b_cls_pad = jnp.zeros((1, LANE), jnp.float32).at[:, :NUM_CLASSES].set(
        params["b_cls"])
    return {
        "proj_table": proj.reshape(vocab, 1, d).astype(jnp.float32),
        "w_hh": params["w_hh"].astype(jnp.float32),
        "w_cls_pad": w_cls_pad,
        "b_cls_pad": b_cls_pad,
    }


def reference_forward(x_tokens, params):
    """Pure-JAX reference of the same forward pass (sanity check)."""
    emb = jnp.take(params["embedding"], x_tokens, axis=0)  # (B, S, D)
    B, S, D = emb.shape
    h = jnp.zeros((B, D), jnp.float32)
    for t in range(S):
        h = jnp.tanh(emb[:, t, :] @ params["w_ih"] + h @ params["w_hh"]
                     + params["b_rnn"])
    return h @ params["w_cls"] + params["b_cls"]


if __name__ == "__main__":
    # Small shapes consistent with the module: vocab=30, vector_dim=32, seq=8.
    VOCAB, D, S, B = 30, 32, 8, 2

    key = jax.random.PRNGKey(0)
    k_param, k_tok = jax.random.split(key)
    params = init_params(k_param, VOCAB, D)
    kparams = prep_kernel_params(params)
    x_tokens = jax.random.randint(k_tok, (B, S), 0, VOCAB, dtype=jnp.int32)

    logits = torchmodel_forward(x_tokens, kparams)
    logits = jax.block_until_ready(logits)

    ref = reference_forward(x_tokens, params)
    assert logits.shape == (B, 3)
    assert jnp.allclose(logits, ref, atol=1e-4, rtol=1e-4)

    print("KERNEL_OK")
</pallas_src>

<mosaic_0001>
module attributes {stable_mosaic.version = 11 : i64} {
  func.func @rnn_classify_kernel(%arg0: memref<2x8xi32, #tpu.memory_space<smem>>, %arg1: memref<30x1x32xf32, #tpu.memory_space<vmem>>, %arg2: memref<32x32xf32, #tpu.memory_space<vmem>>, %arg3: memref<32x128xf32, #tpu.memory_space<vmem>>, %arg4: memref<1x128xf32, #tpu.memory_space<vmem>>, %arg5: memref<2x128xf32, #tpu.memory_space<vmem>>) attributes {dimension_semantics = [], scalar_prefetch = 0 : i64, scratch_operands = 0 : i64, tpu.core_type = #tpu.core_type<tc>} {
    %c0 = arith.constant 0 : index
    %c0_0 = arith.constant 0 : index
    %0 = vector.load %arg2[%c0, %c0_0] : memref<32x32xf32, #tpu.memory_space<vmem>>, vector<32x32xf32>
    %c0_1 = arith.constant 0 : index
    %c0_2 = arith.constant 0 : index
    %1 = memref.load %arg0[%c0_1, %c0_2] : memref<2x8xi32, #tpu.memory_space<smem>>
    %2 = arith.index_cast %1 : i32 to index
    %c0_3 = arith.constant 0 : index
    %c0_4 = arith.constant 0 : index
    %3 = vector.load %arg1[%2, %c0_3, %c0_4] : memref<30x1x32xf32, #tpu.memory_space<vmem>>, vector<1x1x32xf32>
    %4 = vector.shape_cast %3 : vector<1x1x32xf32> to vector<1x32xf32>
    %c1 = arith.constant 1 : index
    %c0_5 = arith.constant 0 : index
    %5 = memref.load %arg0[%c1, %c0_5] : memref<2x8xi32, #tpu.memory_space<smem>>
    %6 = arith.index_cast %5 : i32 to index
    %c0_6 = arith.constant 0 : index
    %c0_7 = arith.constant 0 : index
    %7 = vector.load %arg1[%6, %c0_6, %c0_7] : memref<30x1x32xf32, #tpu.memory_space<vmem>>, vector<1x1x32xf32>
    %8 = vector.shape_cast %7 : vector<1x1x32xf32> to vector<1x32xf32>
    %9 = tpu.concatenate %4, %8 in 0 : vector<1x32xf32>, vector<1x32xf32> -> vector<2x32xf32>
    %10 = math.tanh %9 : vector<2x32xf32>
    %c0_8 = arith.constant 0 : index
    %c1_9 = arith.constant 1 : index
    %11 = memref.load %arg0[%c0_8, %c1_9] : memref<2x8xi32, #tpu.memory_space<smem>>
    %12 = arith.index_cast %11 : i32 to index
    %c0_10 = arith.constant 0 : index
    %c0_11 = arith.constant 0 : index
    %13 = vector.load %arg1[%12, %c0_10, %c0_11] : memref<30x1x32xf32, #tpu.memory_space<vmem>>, vector<1x1x32xf32>
    %14 = vector.shape_cast %13 : vector<1x1x32xf32> to vector<1x32xf32>
    %c1_12 = arith.constant 1 : index
    %c1_13 = arith.constant 1 : index
    %15 = memref.load %arg0[%c1_12, %c1_13] : memref<2x8xi32, #tpu.memory_space<smem>>
    %16 = arith.index_cast %15 : i32 to index
    %c0_14 = arith.constant 0 : index
    %c0_15 = arith.constant 0 : index
    %17 = vector.load %arg1[%16, %c0_14, %c0_15] : memref<30x1x32xf32, #tpu.memory_space<vmem>>, vector<1x1x32xf32>
    %18 = vector.shape_cast %17 : vector<1x1x32xf32> to vector<1x32xf32>
    %19 = tpu.concatenate %14, %18 in 0 : vector<1x32xf32>, vector<1x32xf32> -> vector<2x32xf32>
    %cst = arith.constant dense<0.000000e+00> : vector<2x32xf32>
    %20 = tpu.matmul %10, %0, %cst {dimension_numbers = #tpu.dot_dimension_numbers<[1], [0], [0], [1], [0, 0, 1, 1], [], []>} : vector<2x32xf32>, vector<32x32xf32>, vector<2x32xf32> -> vector<2x32xf32>
    %21 = arith.addf %19, %20 : vector<2x32xf32>
    %22 = math.tanh %21 : vector<2x32xf32>
    %c0_16 = arith.constant 0 : index
    %c2 = arith.constant 2 : index
    %23 = memref.load %arg0[%c0_16, %c2] : memref<2x8xi32, #tpu.memory_space<smem>>
    %24 = arith.index_cast %23 : i32 to index
    %c0_17 = arith.constant 0 : index
    %c0_18 = arith.constant 0 : index
    %25 = vector.load %arg1[%24, %c0_17, %c0_18] : memref<30x1x32xf32, #tpu.memory_space<vmem>>, vector<1x1x32xf32>
    %26 = vector.shape_cast %25 : vector<1x1x32xf32> to vector<1x32xf32>
    %c1_19 = arith.constant 1 : index
    %c2_20 = arith.constant 2 : index
    %27 = memref.load %arg0[%c1_19, %c2_20] : memref<2x8xi32, #tpu.memory_space<smem>>
    %28 = arith.index_cast %27 : i32 to index
    %c0_21 = arith.constant 0 : index
    %c0_22 = arith.constant 0 : index
    %29 = vector.load %arg1[%28, %c0_21, %c0_22] : memref<30x1x32xf32, #tpu.memory_space<vmem>>, vector<1x1x32xf32>
    %30 = vector.shape_cast %29 : vector<1x1x32xf32> to vector<1x32xf32>
    %31 = tpu.concatenate %26, %30 in 0 : vector<1x32xf32>, vector<1x32xf32> -> vector<2x32xf32>
    %cst_23 = arith.constant dense<0.000000e+00> : vector<2x32xf32>
    %32 = tpu.matmul %22, %0, %cst_23 {dimension_numbers = #tpu.dot_dimension_numbers<[1], [0], [0], [1], [0, 0, 1, 1], [], []>} : vector<2x32xf32>, vector<32x32xf32>, vector<2x32xf32> -> vector<2x32xf32>
    %33 = arith.addf %31, %32 : vector<2x32xf32>
    %34 = math.tanh %33 : vector<2x32xf32>
    %c0_24 = arith.constant 0 : index
    %c3 = arith.constant 3 : index
    %35 = memref.load %arg0[%c0_24, %c3] : memref<2x8xi32, #tpu.memory_space<smem>>
    %36 = arith.index_cast %35 : i32 to index
    %c0_25 = arith.constant 0 : index
    %c0_26 = arith.constant 0 : index
    %37 = vector.load %arg1[%36, %c0_25, %c0_26] : memref<30x1x32xf32, #tpu.memory_space<vmem>>, vector<1x1x32xf32>
    %38 = vector.shape_cast %37 : vector<1x1x32xf32> to vector<1x32xf32>
    %c1_27 = arith.constant 1 : index
    %c3_28 = arith.constant 3 : index
    %39 = memref.load %arg0[%c1_27, %c3_28] : memref<2x8xi32, #tpu.memory_space<smem>>
    %40 = arith.index_cast %39 : i32 to index
    %c0_29 = arith.constant 0 : index
    %c0_30 = arith.constant 0 : index
    %41 = vector.load %arg1[%40, %c0_29, %c0_30] : memref<30x1x32xf32, #tpu.memory_space<vmem>>, vector<1x1x32xf32>
    %42 = vector.shape_cast %41 : vector<1x1x32xf32> to vector<1x32xf32>
    %43 = tpu.concatenate %38, %42 in 0 : vector<1x32xf32>, vector<1x32xf32> -> vector<2x32xf32>
    %cst_31 = arith.constant dense<0.000000e+00> : vector<2x32xf32>
    %44 = tpu.matmul %34, %0, %cst_31 {dimension_numbers = #tpu.dot_dimension_numbers<[1], [0], [0], [1], [0, 0, 1, 1], [], []>} : vector<2x32xf32>, vector<32x32xf32>, vector<2x32xf32> -> vector<2x32xf32>
    %45 = arith.addf %43, %44 : vector<2x32xf32>
    %46 = math.tanh %45 : vector<2x32xf32>
    %c0_32 = arith.constant 0 : index
    %c4 = arith.constant 4 : index
    %47 = memref.load %arg0[%c0_32, %c4] : memref<2x8xi32, #tpu.memory_space<smem>>
    %48 = arith.index_cast %47 : i32 to index
    %c0_33 = arith.constant 0 : index
    %c0_34 = arith.constant 0 : index
    %49 = vector.load %arg1[%48, %c0_33, %c0_34] : memref<30x1x32xf32, #tpu.memory_space<vmem>>, vector<1x1x32xf32>
    %50 = vector.shape_cast %49 : vector<1x1x32xf32> to vector<1x32xf32>
    %c1_35 = arith.constant 1 : index
    %c4_36 = arith.constant 4 : index
    %51 = memref.load %arg0[%c1_35, %c4_36] : memref<2x8xi32, #tpu.memory_space<smem>>
    %52 = arith.index_cast %51 : i32 to index
    %c0_37 = arith.constant 0 : index
    %c0_38 = arith.constant 0 : index
    %53 = vector.load %arg1[%52, %c0_37, %c0_38] : memref<30x1x32xf32, #tpu.memory_space<vmem>>, vector<1x1x32xf32>
    %54 = vector.shape_cast %53 : vector<1x1x32xf32> to vector<1x32xf32>
    %55 = tpu.concatenate %50, %54 in 0 : vector<1x32xf32>, vector<1x32xf32> -> vector<2x32xf32>
    %cst_39 = arith.constant dense<0.000000e+00> : vector<2x32xf32>
    %56 = tpu.matmul %46, %0, %cst_39 {dimension_numbers = #tpu.dot_dimension_numbers<[1], [0], [0], [1], [0, 0, 1, 1], [], []>} : vector<2x32xf32>, vector<32x32xf32>, vector<2x32xf32> -> vector<2x32xf32>
    %57 = arith.addf %55, %56 : vector<2x32xf32>
    %58 = math.tanh %57 : vector<2x32xf32>
    %c0_40 = arith.constant 0 : index
    %c5 = arith.constant 5 : index
    %59 = memref.load %arg0[%c0_40, %c5] : memref<2x8xi32, #tpu.memory_space<smem>>
    %60 = arith.index_cast %59 : i32 to index
    %c0_41 = arith.constant 0 : index
    %c0_42 = arith.constant 0 : index
    %61 = vector.load %arg1[%60, %c0_41, %c0_42] : memref<30x1x32xf32, #tpu.memory_space<vmem>>, vector<1x1x32xf32>
    %62 = vector.shape_cast %61 : vector<1x1x32xf32> to vector<1x32xf32>
    %c1_43 = arith.constant 1 : index
    %c5_44 = arith.constant 5 : index
    %63 = memref.load %arg0[%c1_43, %c5_44] : memref<2x8xi32, #tpu.memory_space<smem>>
    %64 = arith.index_cast %63 : i32 to index
    %c0_45 = arith.constant 0 : index
    %c0_46 = arith.constant 0 : index
    %65 = vector.load %arg1[%64, %c0_45, %c0_46] : memref<30x1x32xf32, #tpu.memory_space<vmem>>, vector<1x1x32xf32>
    %66 = vector.shape_cast %65 : vector<1x1x32xf32> to vector<1x32xf32>
    %67 = tpu.concatenate %62, %66 in 0 : vector<1x32xf32>, vector<1x32xf32> -> vector<2x32xf32>
    %cst_47 = arith.constant dense<0.000000e+00> : vector<2x32xf32>
    %68 = tpu.matmul %58, %0, %cst_47 {dimension_numbers = #tpu.dot_dimension_numbers<[1], [0], [0], [1], [0, 0, 1, 1], [], []>} : vector<2x32xf32>, vector<32x32xf32>, vector<2x32xf32> -> vector<2x32xf32>
    %69 = arith.addf %67, %68 : vector<2x32xf32>
    %70 = math.tanh %69 : vector<2x32xf32>
    %c0_48 = arith.constant 0 : index
    %c6 = arith.constant 6 : index
    %71 = memref.load %arg0[%c0_48, %c6] : memref<2x8xi32, #tpu.memory_space<smem>>
    %72 = arith.index_cast %71 : i32 to index
    %c0_49 = arith.constant 0 : index
    %c0_50 = arith.constant 0 : index
    %73 = vector.load %arg1[%72, %c0_49, %c0_50] : memref<30x1x32xf32, #tpu.memory_space<vmem>>, vector<1x1x32xf32>
    %74 = vector.shape_cast %73 : vector<1x1x32xf32> to vector<1x32xf32>
    %c1_51 = arith.constant 1 : index
    %c6_52 = arith.constant 6 : index
    %75 = memref.load %arg0[%c1_51, %c6_52] : memref<2x8xi32, #tpu.memory_space<smem>>
    %76 = arith.index_cast %75 : i32 to index
    %c0_53 = arith.constant 0 : index
    %c0_54 = arith.constant 0 : index
    %77 = vector.load %arg1[%76, %c0_53, %c0_54] : memref<30x1x32xf32, #tpu.memory_space<vmem>>, vector<1x1x32xf32>
    %78 = vector.shape_cast %77 : vector<1x1x32xf32> to vector<1x32xf32>
    %79 = tpu.concatenate %74, %78 in 0 : vector<1x32xf32>, vector<1x32xf32> -> vector<2x32xf32>
    %cst_55 = arith.constant dense<0.000000e+00> : vector<2x32xf32>
    %80 = tpu.matmul %70, %0, %cst_55 {dimension_numbers = #tpu.dot_dimension_numbers<[1], [0], [0], [1], [0, 0, 1, 1], [], []>} : vector<2x32xf32>, vector<32x32xf32>, vector<2x32xf32> -> vector<2x32xf32>
    %81 = arith.addf %79, %80 : vector<2x32xf32>
    %82 = math.tanh %81 : vector<2x32xf32>
    %c0_56 = arith.constant 0 : index
    %c7 = arith.constant 7 : index
    %83 = memref.load %arg0[%c0_56, %c7] : memref<2x8xi32, #tpu.memory_space<smem>>
    %84 = arith.index_cast %83 : i32 to index
    %c0_57 = arith.constant 0 : index
    %c0_58 = arith.constant 0 : index
    %85 = vector.load %arg1[%84, %c0_57, %c0_58] : memref<30x1x32xf32, #tpu.memory_space<vmem>>, vector<1x1x32xf32>
    %86 = vector.shape_cast %85 : vector<1x1x32xf32> to vector<1x32xf32>
    %c1_59 = arith.constant 1 : index
    %c7_60 = arith.constant 7 : index
    %87 = memref.load %arg0[%c1_59, %c7_60] : memref<2x8xi32, #tpu.memory_space<smem>>
    %88 = arith.index_cast %87 : i32 to index
    %c0_61 = arith.constant 0 : index
    %c0_62 = arith.constant 0 : index
    %89 = vector.load %arg1[%88, %c0_61, %c0_62] : memref<30x1x32xf32, #tpu.memory_space<vmem>>, vector<1x1x32xf32>
    %90 = vector.shape_cast %89 : vector<1x1x32xf32> to vector<1x32xf32>
    %91 = tpu.concatenate %86, %90 in 0 : vector<1x32xf32>, vector<1x32xf32> -> vector<2x32xf32>
    %cst_63 = arith.constant dense<0.000000e+00> : vector<2x32xf32>
    %92 = tpu.matmul %82, %0, %cst_63 {dimension_numbers = #tpu.dot_dimension_numbers<[1], [0], [0], [1], [0, 0, 1, 1], [], []>} : vector<2x32xf32>, vector<32x32xf32>, vector<2x32xf32> -> vector<2x32xf32>
    %93 = arith.addf %91, %92 : vector<2x32xf32>
    %94 = math.tanh %93 : vector<2x32xf32>
    %c0_64 = arith.constant 0 : index
    %c0_65 = arith.constant 0 : index
    %95 = vector.load %arg3[%c0_64, %c0_65] : memref<32x128xf32, #tpu.memory_space<vmem>>, vector<32x128xf32>
    %cst_66 = arith.constant dense<0.000000e+00> : vector<2x128xf32>
    %96 = tpu.matmul %94, %95, %cst_66 {dimension_numbers = #tpu.dot_dimension_numbers<[1], [0], [0], [1], [0, 0, 1, 1], [], []>} : vector<2x32xf32>, vector<32x128xf32>, vector<2x128xf32> -> vector<2x128xf32>
    %c0_67 = arith.constant 0 : index
    %c0_68 = arith.constant 0 : index
    %97 = vector.load %arg4[%c0_67, %c0_68] : memref<1x128xf32, #tpu.memory_space<vmem>>, vector<1x128xf32>
    %98 = vector.broadcast %97 : vector<1x128xf32> to vector<2x128xf32>
    %99 = arith.addf %96, %98 : vector<2x128xf32>
    %c0_69 = arith.constant 0 : index
    %c0_70 = arith.constant 0 : index
    %100 = vector.load %arg5[%c0_69, %c0_70] : memref<2x128xf32, #tpu.memory_space<vmem>>, vector<2x128xf32>
    tpu.vector_store %arg5[%c0_69, %c0_70], %99 {strides = array<i32>} : memref<2x128xf32, #tpu.memory_space<vmem>>, vector<2x128xf32>,
    return
  }
}

</mosaic_0001>

<bundles_post_ra>
// kernel: torchmodel_forward.1
= control target key start
LH: loop header
LB: loop body
LE: loop exit
PB: predicated region body
PF: predicated region fallthrough
CT: control target
= control target key end

     0   :  { %10 = vsyncpa [#allocation5], 0  ;;  %s1346_s0 = inlined_call_operand.hbm [shape: s32[2,8], index: 0, kind: input, shape index: {}]   ;;  %s1347_s1 = inlined_call_operand.hbm [shape: f32[30,1,32], index: 1, kind: input, shape index: {}]   ;;  %s1348_s2 = inlined_call_operand.hbm [shape: f32[32,32], index: 2, kind: input, shape index: {}]   ;;  %s1349_s3 = inlined_call_operand.hbm [shape: f32[32,128], index: 3, kind: input, shape index: {}]   ;;  %s1350_s4 = inlined_call_operand.vmem [shape: f32[1,128], index: 4, kind: input, shape index: {}]   ;;  %s1351_s5 = inlined_call_operand.hbm [shape: f32[2,128], index: 5, kind: output, shape index: {}]  }
   0x1   :  { %11 = vsyncpa [#allocation3], 0 }
   0x2   :  { %12 = vsyncpa [#allocation8], 0 }
   0x3   :  { %13 = vsyncpa [#allocation4], 0  ;;  %s1169_s18 = smov [#allocation7]   ;;  %s1063_s22 = scalar_lea.hbm %s1348_s2, 512 }
   0x4   :  { %s39_s19 = sshll.u32 %s1169_s18, 4  ;;  %p1064_p0 = scmp.ne.s32.totalorder %s1348_s2, %s1063_s22  ;;  %s40_s19 = int_to_ptr.vmem [resolvable:$true] %s39_s19 }
   0x5   :  { %p1067_p1 = scmp.lt.u32.totalorder %s1063_s22, %s1348_s2 }
   0x7   :  { %p1069_p2 = pnand %p1067_p1, %p1064_p0 }
   0x9   :  { %1072 = shalt.err (!%p1069_p2)
}
   0xa   :  { %s1073_s27 = scalar_lea.vmem %s40_s19, 512  ;;  %p1078_p4 = scmp.lt.s32.totalorder %s40_s19, %s40_s19 }
   0xb   :  { %p1074_p3 = scmp.ne.s32.totalorder %s40_s19, %s1073_s27  ;;  %p1079_p5 = scmp.lt.s32.totalorder %s1073_s27, %s1073_s27 }
   0xd   :  { %p1080_p6 = por %p1079_p5, %p1078_p4 }
   0xf   :  { %p1081_p7 = pnand %p1080_p6, %p1074_p3 }
  0x11   :  { %1084 = shalt.err (!%p1081_p7)
}
  0x12   :  { %s1170_s28 = smov 128   ;;  %s1171_s29 = smov 8  }
  0x13   :  { %45 = dma.hbm_to_vmem [thread:$0]  %s1348_s2, 512, %s40_s19, [#allocation8], %s1170_s28, %s1170_s28, %s1171_s29  }
  0x14   :  { %s1085_s9 = scalar_lea.hbm %s1346_s0, 32 }
  0x15   :  { %p1086_p8 = scmp.ne.s32.totalorder %s1346_s0, %s1085_s9  ;;  %p1089_p9 = scmp.lt.u32.totalorder %s1085_s9, %s1346_s0 }
  0x17   :  { %p1091_p10 = pnand %p1089_p9, %p1086_p8 }
  0x19   :  { %1094 = shalt.err (!%p1091_p10)
}
  0x1a   :  { %s1172_s14 = smov [#allocation2]   ;;  %s1173_s2 = smov [#allocation6]  }
  0x1b   :  { %21 = dma.hbm_to_smem %s1346_s0, 32, %s1172_s14, [#allocation5]  }
  0x1c   :  { %s27_s17 = sshll.u32 %s1173_s2, 4  ;;  %s1095_s20 = scalar_lea.hbm %s1347_s1, 480  ;;  %s28_s17 = int_to_ptr.vmem [resolvable:$true] %s27_s17 }
  0x1d   :  { %p1096_p11 = scmp.ne.s32.totalorder %s1347_s1, %s1095_s20  ;;  %p1099_p12 = scmp.lt.u32.totalorder %s1095_s20, %s1347_s1 }
  0x1f   :  { %p1101_p13 = pnand %p1099_p12, %p1096_p11 }
  0x21   :  { %1104 = shalt.err (!%p1101_p13)
}
  0x22   :  { %s1105_s25 = scalar_lea.vmem %s28_s17, 480  ;;  %p1110_p1 = scmp.lt.s32.totalorder %s28_s17, %s28_s17 }
  0x23   :  { %p1106_p0 = scmp.ne.s32.totalorder %s28_s17, %s1105_s25  ;;  %p1111_p2 = scmp.lt.s32.totalorder %s1105_s25, %s1105_s25 }
  0x25   :  { %p1112_p3 = por %p1111_p2, %p1110_p1 }
  0x27   :  { %p1113_p4 = pnand %p1112_p3, %p1106_p0 }
  0x29   :  { %1116 = shalt.err (!%p1113_p4)
}
  0x2a   :  { %s1174_s0 = smov 16   ;;  %s1175_s26 = smov 1  }
  0x2b   :  { %33 = dma.hbm_to_vmem [thread:$0]  %s1347_s1, 480, %s28_s17, [#allocation3], %s1174_s0, %s1174_s0, %s1175_s26  }
  0x2c   :  { %s1176_s6 = smov [#allocation9]   ;;  %s1117_s10 = scalar_lea.hbm %s1349_s3, 512 }
  0x2d   :  { %s51_s7 = sshll.u32 %s1176_s6, 4  ;;  %p1118_p5 = scmp.ne.s32.totalorder %s1349_s3, %s1117_s10  ;;  %s52_s7 = int_to_ptr.vmem [resolvable:$true] %s51_s7 }
  0x2e   :  { %p1121_p6 = scmp.lt.u32.totalorder %s1117_s10, %s1349_s3 }
  0x30   :  { %p1123_p7 = pnand %p1121_p6, %p1118_p5 }
  0x32   :  { %1126 = shalt.err (!%p1123_p7)
}
  0x33   :  { %s1127_s15 = scalar_lea.vmem %s52_s7, 512  ;;  %p1132_p9 = scmp.lt.s32.totalorder %s52_s7, %s52_s7 }
  0x34   :  { %p1128_p8 = scmp.ne.s32.totalorder %s52_s7, %s1127_s15  ;;  %p1133_p10 = scmp.lt.s32.totalorder %s1127_s15, %s1127_s15 }
  0x36   :  { %p1134_p11 = por %p1133_p10, %p1132_p9 }
  0x38   :  { %p1135_p12 = pnand %p1134_p11, %p1128_p8 }
  0x3a   :  { %1138 = shalt.err (!%p1135_p12)
}
  0x3b   :  { %57 = dma.hbm_to_vmem [thread:$0]  %s1349_s3, 512, %s52_s7, [#allocation8], %s1170_s28, %s1170_s28, %s1171_s29  }
  0x3c   :  { %1161 = dma.done.wait [#allocation5], 32  }
  0x3d   :  { %1162 = vsyncadd [#allocation5], 4294967264 }
  0x3e   :  { %1163 = dma.done.wait [#allocation3], 480  }
  0x3f   :  { %1164 = vsyncadd [#allocation3], 4294966816 }
  0x40   :  { %1165 = dma.done.wait [#allocation8], 1024  }
  0x41   :  { %1166 = vsyncadd [#allocation8], 4294966272 }
  0x42   :  { %72 = sfence }
  0x43   :  { %v73_v0 = vld [vmem:[#allocation7] sm:$0xff]  ;;  %v74_v1 = vld [vmem:[#allocation7 + $0x8] sm:$0xff]  ;;  %v75_v2 = vld [vmem:[#allocation7 + $0x10] sm:$0xff]  ;;  %v1177_v3 = vmov 0.0|0.0   ;;  %vm1178_vm0 = vmmov 0   ;;  %v1179_v6 = vmov 0.0  }
  0x44   :  { %987 = vmatprep.subr.bf16.mxu0 %v1177_v3  ;;  %v1266_v4 = vpack.c.bf16 %v74_v1, %v73_v0  ;;  %v76_v5 = vld [vmem:[#allocation7 + $0x18] sm:$0xff]  ;;  %907 = vmatprep.mubr.msk.f32.mxu0 %vm1178_vm0, %v1179_v6  ;;  %s77_s3 = sld [smem:[#allocation2]]  ;;  %vm89_vm1 = vcmask 1040384   ;;  %vm105_vm2 = vcmask 261120   ;;  %s829_s17 = sld [smem:[#allocation2 + $0x1]]  ;;  %v709_v54 = vld [vmem:[#allocation9] sm:$0xff] }
  0x45   :  { %s827_s28 = sld [smem:[#allocation2 + $0x80]]  ;;  %993 = vmatprep.subr.bf16.mxu1 %v1177_v3  ;;  %918 = vmatprep.mubr.msk.f32.mxu1 %vm1178_vm0, %v1179_v6  ;;  %v1274_v7 = vpack.c.bf16 %v76_v5, %v75_v2  ;;  %s830_s18 = sld [smem:[#allocation2 + $0x81]]  ;;  %v710_v55 = vld [vmem:[#allocation9 + $0x8] sm:$0xff]  ;;  %v711_v56 = vld [vmem:[#allocation9 + $0x10] sm:$0xff]  ;;  %v712_v58 = vld [vmem:[#allocation9 + $0x18] sm:$0xff] }
  0x46   :  { %989 = vmatpush3.bf16.msra.mxu0 %v1266_v4  ;;  %995 = vmatpush3.bf16.msra.mxu1 %v1266_v4  ;;  %s833_s21 = sld [smem:[#allocation2 + $0x2]]  ;;  %s837_s25 = sld [smem:[#allocation2 + $0x3]]  ;;  %v1030_v57 = vpack.c.bf16 %v710_v55, %v709_v54  ;;  %v1033_v59 = vpack.c.bf16 %v712_v58, %v711_v56 }
  0x47   :  { %990 = vmatprep.subr.bf16.mxu0 %v1177_v3  ;;  %996 = vmatprep.subr.bf16.mxu1 %v1177_v3  ;;  %s834_s22 = sld [smem:[#allocation2 + $0x82]]  ;;  %s838_s0 = sld [smem:[#allocation2 + $0x83]] }
  0x48   :  { %s841_s30 = sld [smem:[#allocation2 + $0x4]]  ;;  %s845_s9 = sld [smem:[#allocation2 + $0x5]] }
  0x49   :  { %s842_s6 = sld [smem:[#allocation2 + $0x84]]  ;;  %s846_s10 = sld [smem:[#allocation2 + $0x85]] }
  0x4a   :  { %992 = vmatpush3.bf16.msra.mxu0 %v1274_v7  ;;  %998 = vmatpush3.bf16.msra.mxu1 %v1274_v7  ;;  %s78_s29 = scalar_lea.vmem [#allocation6], %s77_s3  ;;  %s93_s19 = scalar_lea.vmem [#allocation6], %s829_s17 }
  0x4b   :  { %v79_v8 = vld [vmem:[%s78_s29] sm:$0x1]  ;;  %s81_s2 = scalar_lea.vmem [#allocation6], %s827_s28  ;;  %999 = vmatprep.subr.bf16.mxu0 %v1177_v3  ;;  %1005 = vmatprep.subr.bf16.mxu1 %v1177_v3  ;;  %s96_s20 = scalar_lea.vmem [#allocation6], %s830_s18 }
  0x4c   :  { %v828_v9 = vld [vmem:[%s81_s2] ss:$0 sm:$0xff]  ;;  %s182_s23 = scalar_lea.vmem [#allocation6], %s833_s21  ;;  %s270_s26 = scalar_lea.vmem [#allocation6], %s837_s25 }
  0x4d   :  { %v90_v10 = vsel %vm89_vm1, %v79_v8, %v828_v9  ;;  %v94_v12 = vld [vmem:[%s93_s19] sm:$0x1]  ;;  %s185_s24 = scalar_lea.vmem [#allocation6], %s834_s22  ;;  %s273_s27 = scalar_lea.vmem [#allocation6], %s838_s0 }
  0x4e   :  { %1047 = vtanh.f32 %v90_v10  ;;  %v831_v13 = vld [vmem:[%s96_s20] ss:$0 sm:$0xff]  ;;  %s358_s7 = scalar_lea.vmem [#allocation6], %s841_s30  ;;  %s446_s11 = scalar_lea.vmem [#allocation6], %s845_s9 }
  0x4f   :  { %v104_v14 = vsel %vm89_vm1, %v94_v12, %v831_v13  ;;  %v183_v19 = vld [vmem:[%s182_s23] sm:$0x1]  ;;  %s361_s8 = scalar_lea.vmem [#allocation6], %s842_s6  ;;  %s449_s12 = scalar_lea.vmem [#allocation6], %s846_s10 }
  0x50   :  { %v835_v20 = vld [vmem:[%s185_s24] ss:$0 sm:$0xff]  ;;  %s849_s13 = sld [smem:[#allocation2 + $0x6]]  ;;  %s853_s16 = sld [smem:[#allocation2 + $0x7]] }
  0x51   :  { %v193_v21 = vsel %vm89_vm1, %v183_v19, %v835_v20  ;;  %v271_v26 = vld [vmem:[%s270_s26] sm:$0x1]  ;;  %s850_s14 = sld [smem:[#allocation2 + $0x86]]  ;;  %s854_s3 = sld [smem:[#allocation2 + $0x87]] }
  0x52   :  { %v839_v27 = vld [vmem:[%s273_s27] ss:$0 sm:$0xff]  ;;  %s1180_s18 = smov [#allocation10]  }
  0x53   :  { %v281_v28 = vsel %vm89_vm1, %v271_v26, %v839_v27  ;;  %v359_v33 = vld [vmem:[%s358_s7] sm:$0x1]  ;;  %s800_s19 = sshll.u32 %s1180_s18, 4  ;;  %s801_s19 = int_to_ptr.vmem [resolvable:$true] %s800_s19 }
  0x54   :  { %v843_v34 = vld [vmem:[%s361_s8] ss:$0 sm:$0xff]  ;;  %s1139_s20 = scalar_lea.vmem %s801_s19, 32  ;;  %p1144_p0 = scmp.lt.s32.totalorder %s801_s19, %s801_s19 }
  0x55   :  { %v369_v35 = vsel %vm89_vm1, %v359_v33, %v843_v34  ;;  %v447_v40 = vld [vmem:[%s446_s11] sm:$0x1]  ;;  %p1140_p13 = scmp.ne.s32.totalorder %s801_s19, %s1139_s20  ;;  %p1145_p1 = scmp.lt.s32.totalorder %s1139_s20, %s1139_s20 }
  0x56   :  { %v847_v41 = vld [vmem:[%s449_s12] ss:$0 sm:$0xff]  ;;  %s534_s15 = scalar_lea.vmem [#allocation6], %s849_s13  ;;  %s622_s28 = scalar_lea.vmem [#allocation6], %s853_s16 }
  0x57   :  { %v457_v42 = vsel %vm89_vm1, %v447_v40, %v847_v41  ;;  %v535_v47 = vld [vmem:[%s534_s15] sm:$0x1]  ;;  %s537_s1 = scalar_lea.vmem [#allocation6], %s850_s14  ;;  %s625_s29 = scalar_lea.vmem [#allocation6], %s854_s3 }
  0x58   :  { %v1048_v11 = vpop.eup %1047  ;;  %v851_v48 = vld [vmem:[%s537_s1] ss:$0 sm:$0xff]  ;;  %p1146_p2 = por %p1145_p1, %p1144_p0 }
  0x59   :  { %908 = vmatmul.mubr.msk.f32.vlgmr.msra.gmra.mrb[0].mxu0 %vm105_vm2, %v1048_v11  ;;  %v545_v49 = vsel %vm89_vm1, %v535_v47, %v851_v48  ;;  %v623_v60 = vld [vmem:[%s622_s28] sm:$0x1] }
  0x5a   :  { %1001 = vmatpush3.bf16.msra.mxu0 %v1266_v4  ;;  %929 = vmatprep.mubr.msk.f32.mxu0 %vm1178_vm0, %v1179_v6  ;;  %v855_v61 = vld [vmem:[%s625_s29] ss:$0 sm:$0xff]  ;;  %p1147_p3 = pnand %p1146_p2, %p1140_p13 }
  0x5b   :  { %1002 = vmatprep.subr.bf16.mxu0 %v1177_v3  ;;  %v633_v62 = vsel %vm89_vm1, %v623_v60, %v855_v61 }
  0x5e   :  { %1004 = vmatpush3.bf16.msra.mxu0 %v1274_v7 }
  0x5f   :  { %1011 = vmatprep.subr.bf16.mxu0 %v1177_v3 }
 0x12c   :  { %v175_v15 = vpop.f32.mrb[0].mxu0 }
 0x12d   :  { %v179_v16 = vadd.f32 %v175_v15, %v104_v14  ;;  %v909_v17 = vpop.f32.mrb[1].mxu0 }
 0x12f   :  { %1049 = vtanh.f32 %v179_v16 }
 0x139   :  { %v1050_v18 = vpop.eup %1049 }
 0x13a   :  { %919 = vmatmul.mubr.msk.f32.vlgmr.msra.gmra.mrb[0].mxu1 %vm105_vm2, %v1050_v18 }
 0x13b   :  { %1007 = vmatpush3.bf16.msra.mxu1 %v1266_v4  ;;  %940 = vmatprep.mubr.msk.f32.mxu1 %vm1178_vm0, %v1179_v6 }
 0x13c   :  { %1008 = vmatprep.subr.bf16.mxu1 %v1177_v3 }
 0x13f   :  { %1010 = vmatpush3.bf16.msra.mxu1 %v1274_v7 }
 0x140   :  { %1017 = vmatprep.subr.bf16.mxu1 %v1177_v3 }
 0x20d   :  { %v263_v22 = vpop.f32.mrb[0].mxu1 }
 0x20e   :  { %v267_v23 = vadd.f32 %v263_v22, %v193_v21  ;;  %v920_v24 = vpop.f32.mrb[1].mxu1 }
 0x210   :  { %1051 = vtanh.f32 %v267_v23 }
 0x21a   :  { %v1052_v25 = vpop.eup %1051 }
 0x21b   :  { %930 = vmatmul.mubr.msk.f32.vlgmr.msra.gmra.mrb[2].mxu0 %vm105_vm2, %v1052_v25 }
 0x21c   :  { %1013 = vmatpush3.bf16.msra.mxu0 %v1266_v4  ;;  %951 = vmatprep.mubr.msk.f32.mxu0 %vm1178_vm0, %v1179_v6 }
 0x21d   :  { %1014 = vmatprep.subr.bf16.mxu0 %v1177_v3 }
 0x220   :  { %1016 = vmatpush3.bf16.msra.mxu0 %v1274_v7 }
 0x221   :  { %1023 = vmatprep.subr.bf16.mxu0 %v1177_v3 }
 0x2ee   :  { %v351_v29 = vpop.f32.mrb[2].mxu0 }
 0x2ef   :  { %v355_v30 = vadd.f32 %v351_v29, %v281_v28  ;;  %v931_v31 = vpop.f32.mrb[3].mxu0 }
 0x2f1   :  { %1053 = vtanh.f32 %v355_v30 }
 0x2fb   :  { %v1054_v32 = vpop.eup %1053 }
 0x2fc   :  { %941 = vmatmul.mubr.msk.f32.vlgmr.msra.gmra.mrb[2].mxu1 %vm105_vm2, %v1054_v32 }
 0x2fd   :  { %1019 = vmatpush3.bf16.msra.mxu1 %v1266_v4  ;;  %962 = vmatprep.mubr.msk.f32.mxu1 %vm1178_vm0, %v1179_v6 }
 0x2fe   :  { %1020 = vmatprep.subr.bf16.mxu1 %v1177_v3 }
 0x301   :  { %1022 = vmatpush3.bf16.msra.mxu1 %v1274_v7 }
 0x302   :  { %1029 = vmatprep.subr.bf16.mxu1 %v1177_v3 }
 0x3cf   :  { %v439_v36 = vpop.f32.mrb[2].mxu1 }
 0x3d0   :  { %v443_v37 = vadd.f32 %v439_v36, %v369_v35  ;;  %v942_v38 = vpop.f32.mrb[3].mxu1 }
 0x3d2   :  { %1055 = vtanh.f32 %v443_v37 }
 0x3dc   :  { %v1056_v39 = vpop.eup %1055 }
 0x3dd   :  { %952 = vmatmul.mubr.msk.f32.vlgmr.msra.gmra.mrb[4].mxu0 %vm105_vm2, %v1056_v39 }
 0x3de   :  { %1025 = vmatpush3.bf16.msra.mxu0 %v1266_v4  ;;  %973 = vmatprep.mubr.msk.f32.mxu0 %vm1178_vm0, %v1179_v6 }
 0x3df   :  { %1026 = vmatprep.subr.bf16.mxu0 %v1177_v3 }
 0x3e2   :  { %1028 = vmatpush3.bf16.msra.mxu0 %v1274_v7 }
 0x4b0   :  { %v527_v43 = vpop.f32.mrb[4].mxu0 }
 0x4b1   :  { %v531_v44 = vadd.f32 %v527_v43, %v457_v42  ;;  %v953_v45 = vpop.f32.mrb[5].mxu0 }
 0x4b3   :  { %1057 = vtanh.f32 %v531_v44 }
 0x4bd   :  { %v1058_v46 = vpop.eup %1057 }
 0x4be   :  { %963 = vmatmul.mubr.msk.f32.vlgmr.msra.gmra.mrb[4].mxu1 %vm105_vm2, %v1058_v46 }
 0x4bf   :  { %984 = vmatprep.mubr.msk.f32.mxu1 %vm1178_vm0, %v1179_v6  ;;  %1031 = vmatpush3.bf16.msra.mxu1 %v1030_v57 }
 0x4c0   :  { %1032 = vmatprep.subr.bf16.mxu1 %v1177_v3  ;;  %v857_v3 = vld [vmem:[%s1350_s4] ss:$0 sm:$0xff] }
 0x4c3   :  { %1034 = vmatpush3.bf16.msra.mxu1 %v1033_v59 }
 0x591   :  { %v615_v50 = vpop.f32.mrb[4].mxu1 }
 0x592   :  { %v619_v51 = vadd.f32 %v615_v50, %v545_v49  ;;  %v964_v52 = vpop.f32.mrb[5].mxu1 }
 0x594   :  { %1059 = vtanh.f32 %v619_v51 }
 0x59e   :  { %v1060_v53 = vpop.eup %1059 }
 0x59f   :  { %974 = vmatmul.mubr.msk.f32.vlgmr.msra.gmra.mrb[6].mxu0 %vm105_vm2, %v1060_v53 }
 0x672   :  { %v703_v63 = vpop.f32.mrb[6].mxu0 }
 0x673   :  { %v707_v0 = vadd.f32 %v703_v63, %v633_v62  ;;  %v975_v1 = vpop.f32.mrb[7].mxu0 }
 0x675   :  { %1061 = vtanh.f32 %v707_v0 }
 0x67f   :  { %v1062_v2 = vpop.eup %1061 }
 0x680   :  { %985 = vmatmul.mubr.msk.f32.vlgmr.msra.gmra.mrb[6].mxu1 %vm105_vm2, %v1062_v2 }
 0x753   :  { %v789_v4 = vpop.f32.mrb[6].mxu1 }
 0x754   :  { %v790_v5 = vadd.f32 %v857_v3, %v789_v4  ;;  %v986_v6 = vpop.f32.mrb[7].mxu1 }
 0x756   :  { %793 = vst [vmem:[#allocation10] sm:$0x3] %v790_v5 }
 0x757   :  { %1150 = shalt.err (!%p1147_p3)
}
 0x758   :  { %s1151_s23 = scalar_lea.hbm %s1351_s5, 32 }
 0x759   :  { %p1152_p4 = scmp.ne.s32.totalorder %s1351_s5, %s1151_s23  ;;  %p1155_p5 = scmp.lt.u32.totalorder %s1151_s23, %s1351_s5 }
 0x75b   :  { %p1157_p6 = pnand %p1155_p5, %p1152_p4 }
 0x75d   :  { %1160 = shalt.err (!%p1157_p6)
}
 0x75e   :  { %803 = dma.vmem_to_hbm [thread:$0]  %s801_s19, 32, %s1351_s5, [#allocation4]  }
 0x75f   :  { %1167 = dma.done.wait [#allocation4], 32  }
 0x760   :  { %1168 = vsyncadd [#allocation4], 4294967264 }
 0x761   :  { %807 = vsyncpa [#allocation3], 1 }
 0x762   :  { %808 = vsyncpa [#allocation8], 1 }
 0x763   :  { %809 = vsyncpa [#allocation4], 1 }
 0x764   :  { %810 = vsyncpa [#allocation5], 1 }

</bundles_post_ra>
